<compile_context>
chip_gen: v7x
topology: tpu7x:2x2x1
jax: 0.10.0
libtpu: 0.0.40
codegen_flags: <defaults>
</compile_context>

<pallas_src>
import jax
import jax.numpy as jnp
from jax.experimental import pallas as pl
from jax.experimental.pallas import tpu as pltpu


# ----------------------------------------------------------------------------
# Faithful translation: forward() takes no inputs, does nothing, returns None.
# ----------------------------------------------------------------------------
def mymodel_forward():
    """Faithful equivalent of MyModel.forward: no inputs, no ops, returns None."""
    return None


def mymodel_passthrough(x: jax.Array) -> jax.Array:
    """Recommended production fast path if a tensor must flow through: no kernel."""
    return x


# ----------------------------------------------------------------------------
# Structural Pallas path #1 (preferred if a pallas_call must exist):
# single HBM -> HBM DMA, no VMEM staging, no grid, no per-tile overhead.
# ----------------------------------------------------------------------------
def _hbm_copy_kernel(x_hbm_ref, o_hbm_ref, sem):
    cp = pltpu.make_async_copy(x_hbm_ref, o_hbm_ref, sem)
    cp.start()
    cp.wait()


def mymodel_forward_pallas(x: jax.Array) -> jax.Array:
    """Identity pass-through implemented as one direct HBM->HBM DMA."""
    return pl.pallas_call(
        _hbm_copy_kernel,
        out_shape=jax.ShapeDtypeStruct(x.shape, x.dtype),
        in_specs=[pl.BlockSpec(memory_space=pl.ANY)],
        out_specs=pl.BlockSpec(memory_space=pl.ANY),
        scratch_shapes=[pltpu.SemaphoreType.DMA(())],
    )(x)


# ----------------------------------------------------------------------------
# Structural Pallas path #2: tiled, pipelined VMEM copy (kept for reference).
# Tiles sized by bytes (~2 MiB), dtype-aware sublane rounding, tile divides
# rows exactly (no masked tail), parallel grid so v7x can use both TCs.
# ----------------------------------------------------------------------------
def _identity_kernel(x_ref, o_ref):
    o_ref[...] = x_ref[...]


# Minimum second-to-last-dim multiple per dtype width (vreg sublane packing).
_SUBLANE_MULTIPLE = {4: 8, 2: 16, 1: 32}


def mymodel_forward_pallas_tiled(
    x: jax.Array, *, target_tile_bytes: int = 2 << 20
) -> jax.Array:
    """Tiled VMEM-staged identity copy with generation-safe tile sizing."""
    rows, cols = x.shape
    itemsize = jnp.dtype(x.dtype).itemsize
    sub = _SUBLANE_MULTIPLE.get(itemsize, 8)

    # Require lane-dense (cols % 128) and dtype-correct sublane divisibility;
    # otherwise just take the true no-op path.
    if rows % sub != 0 or cols % 128 != 0:
        return x

    # Size the row tile by bytes (~2 MiB target). The pipeline double-buffers
    # input and output (~4x tile bytes resident), so 2 MiB tiles stay well
    # under the 16 MiB scoped-VMEM default on v5e and the limits on v6e/v7x.
    row_bytes = cols * itemsize
    tr = min(rows, max(sub, target_tile_bytes // row_bytes))
    tr = max(sub, (tr // sub) * sub)
    # Shrink until tr divides rows exactly -> no masked partial tail tile.
    while tr > sub and rows % tr != 0:
        tr -= sub
    if rows % tr != 0:
        tr = sub  # rows % sub == 0 is guaranteed above

    grid = (rows // tr,)
    return pl.pallas_call(
        _identity_kernel,
        out_shape=jax.ShapeDtypeStruct((rows, cols), x.dtype),
        grid=grid,
        in_specs=[pl.BlockSpec((tr, cols), lambda i: (i, 0))],
        out_specs=pl.BlockSpec((tr, cols), lambda i: (i, 0)),
        compiler_params=pltpu.CompilerParams(
            dimension_semantics=("parallel",),
        ),
    )(x)


if __name__ == "__main__":
    key = jax.random.PRNGKey(0)
    # Small deterministic example tensor: 512 rows x 256 lanes, f32 (512 KiB).
    # Lane-dense (256 % 128 == 0) and sublane-aligned (512 % 8 == 0).
    x = jax.random.normal(key, (512, 256), dtype=jnp.float32)

    # 1) Faithful no-op forward (no inputs, no ops, returns None).
    assert mymodel_forward() is None

    # 2) Recommended production fast path: no kernel at all.
    y_pass = mymodel_passthrough(x)
    jax.block_until_ready(y_pass)

    # 3) Structural Pallas path: single HBM->HBM DMA.
    y_dma = mymodel_forward_pallas(x)
    jax.block_until_ready(y_dma)

    # 4) Tiled VMEM-staged copy (reference variant, fixed per review).
    y_tiled = mymodel_forward_pallas_tiled(x)
    jax.block_until_ready(y_tiled)

    # Sanity: every path is an exact identity.
    for y in (y_pass, y_dma, y_tiled):
        assert y.shape == x.shape and y.dtype == x.dtype
        assert bool(jnp.array_equal(y, x))

    print("KERNEL_OK")
</pallas_src>

<mosaic_0001>
module attributes {stable_mosaic.version = 11 : i64} {
  func.func @_hbm_copy_kernel(%arg0: memref<512x256xf32, #tpu.memory_space<any>>, %arg1: memref<512x256xf32, #tpu.memory_space<any>>, %arg2: memref<!tpu.dma_semaphore, #tpu.memory_space<semaphore_mem>>) attributes {dimension_semantics = [], scalar_prefetch = 0 : i64, scratch_operands = 1 : i64, tpu.core_type = #tpu.core_type<tc>} {
    tpu.enqueue_dma source(%arg0 : memref<512x256xf32, #tpu.memory_space<any>>) target(%arg1 : memref<512x256xf32, #tpu.memory_space<any>>) target_semaphore(%arg2 : memref<!tpu.dma_semaphore, #tpu.memory_space<semaphore_mem>>)
    tpu.wait_dma2 semaphore(%arg2 : memref<!tpu.dma_semaphore, #tpu.memory_space<semaphore_mem>>) src(%arg0 : memref<512x256xf32, #tpu.memory_space<any>>) dst(%arg1 : memref<512x256xf32, #tpu.memory_space<any>>)
    return
  }
}

</mosaic_0001>

<bundles_post_ra>
// kernel: tpu_custom_call.1
= control target key start
LH: loop header
LB: loop body
LE: loop exit
PB: predicated region body
PF: predicated region fallthrough
CT: control target
= control target key end

     0   :  { %s35_s6 = smov [#allocation2]   ;;  %s36_s7 = smov [#allocation3]   ;;  %s54_s0 = inlined_call_operand.hbm [shape: f32[512,256], index: 0, kind: input, shape index: {}]   ;;  %s55_s1 = inlined_call_operand.hbm [shape: f32[512,256], index: 1, kind: output, shape index: {}]  }
   0x1   :  { %s37_s8 = smov 0  }
   0x2   :  { %18 = dma.general %s54_s0, 16384, %s55_s1, %s35_s6, %s36_s7, [#allocation4], %s37_s8, 0  }
   0x3   :  { %33 = dma.done.wait [#allocation2], 16384 }
   0x4   :  { %34 = vsyncadd [#allocation2], 4294950912 }
   0x5   :  { %23 = vsyncmov [#allocation2] }
   0x8   :  { %s24_s13 = vpop.sfrf %23 }
   0x9   :  { %p29_p0 = scmp.ne.s32.totalorder %s24_s13, 0 }
   0xb   :  { %28 = shalt.err (%p29_p0)  }

</bundles_post_ra>
